<compile_context>
chip_gen: v7x
topology: tpu7x:2x2x1
jax: 0.10.0
libtpu: 0.0.40
codegen_flags: <defaults>
</compile_context>

<pallas_src>
import functools

import numpy as np
import jax
import jax.numpy as jnp
from jax import lax
from jax.experimental import pallas as pl
from jax.experimental.pallas import tpu as pltpu

VMEM = pltpu.MemorySpace.VMEM


def _vmem(n):
    return [pl.BlockSpec(memory_space=VMEM) for _ in range(n)]


# ---------------------------------------------------------------------------
# Fused kernel: inverse mel scale + full Griffin-Lim loop, everything in VMEM.
# ---------------------------------------------------------------------------
def gl_fused_kernel(mel_ref, pinv_ref, ang_ref, fwdb_ref, invb_ref, invenv_ref,
                    shift_ref, sel_ref, headop_ref, tailop_ref, out_ref,
                    *, n_iter, momentum, power):
    t = mel_ref.shape[0]                 # number of STFT frames
    f_pad = pinv_ref.shape[1]            # lane-padded one-sided bin count
    n_fft = invb_ref.shape[1]
    hop = invenv_ref.shape[1]
    n_rows = invenv_ref.shape[0]         # t - 1 + n_fft // hop  (signal rows of `hop`)
    r_blk = n_fft // hop                 # frames overlapping one hop
    pr = (n_fft // 2) // hop             # center-pad measured in hop-rows

    # ---- InverseMelScale: min-norm lstsq (pinv matmul) + clamp + **(1/power) ----
    s = jnp.dot(mel_ref[...], pinv_ref[...], preferred_element_type=jnp.float32)
    s = jnp.maximum(s, 0.0)                                   # (t, f_pad), time-major
    if power == 2.0:
        mag = jnp.sqrt(s)
    elif power == 1.0:
        mag = s
    else:
        mag = jnp.where(s > 0.0,
                        jnp.exp(jnp.log(jnp.maximum(s, 1e-30)) * (1.0 / power)), 0.0)
    mag2 = jnp.concatenate([mag, mag], axis=1)                # scales stacked [re | im]

    # Constants: loaded into vregs/VMEM once, reused across all iterations.
    fwdb = fwdb_ref[...]        # (n_fft, 2*f_pad)   windowed forward DFT basis
    invb = invb_ref[...]        # (2*f_pad, n_fft)   windowed one-sided inverse DFT basis
    inv_env = invenv_ref[...]   # (n_rows, hop)      1 / NOLA window envelope
    shift = shift_ref[...]      # (n_rows, r_blk*t)  overlap-add shift operators
    sel = sel_ref[...]          # (4*pr, n_rows)     reflect-pad row selectors
    head_op = headop_ref[...]   # (2*hop, hop)       reflect-pad lane operator (head)
    tail_op = tailop_ref[...]   # (2*hop, hop)       reflect-pad lane operator (tail)

    def istft_rows(spec):
        # spec (t, 2*f_pad) -> windowed frames -> overlap-add (shift matmuls) -> NOLA.
        frames = jnp.dot(spec, invb, preferred_element_type=jnp.float32)   # (t, n_fft)
        ola = jnp.dot(shift[:, :t], frames[:, :hop],
                      preferred_element_type=jnp.float32)
        for r in range(1, r_blk):
            ola = ola + jnp.dot(shift[:, r * t:(r + 1) * t],
                                frames[:, r * hop:(r + 1) * hop],
                                preferred_element_type=jnp.float32)
        return ola * inv_env                                               # (n_rows, hop)

    def stft_rows(z2d):
        # center-trim + reflect-pad + framing + windowed DFT, all shifts / matmuls.
        b = jnp.dot(sel, z2d, preferred_element_type=jnp.float32)          # (4*pr, hop)
        head = jnp.dot(jnp.concatenate([b[0:pr], b[pr:2 * pr]], axis=1),
                       head_op, preferred_element_type=jnp.float32)        # (pr, hop)
        tail = jnp.dot(jnp.concatenate([b[2 * pr:3 * pr], b[3 * pr:4 * pr]], axis=1),
                       tail_op, preferred_element_type=jnp.float32)        # (pr, hop)
        xp = jnp.concatenate([head, z2d[pr:pr + t - 1, :], tail], axis=0)  # (n_rows, hop)
        frames = jnp.concatenate([xp[r:r + t, :] for r in range(r_blk)],
                                 axis=1)                                   # (t, n_fft)
        return jnp.dot(frames, fwdb, preferred_element_type=jnp.float32)   # (t, 2*f_pad)

    def body(_, carry):
        ang, tprev = carry
        rebuilt = stft_rows(istft_rows(mag2 * ang))
        a = rebuilt - momentum * tprev
        a_re = a[:, :f_pad]
        a_im = a[:, f_pad:]
        # rsqrt + mul instead of sqrt + div (eps moves inside the sqrt, tiny change).
        inv = lax.rsqrt(a_re * a_re + a_im * a_im + 1e-16)
        ang_new = jnp.concatenate([a_re * inv, a_im * inv], axis=1)
        return ang_new, rebuilt

    ang0 = ang_ref[...]
    ang_final, _ = lax.fori_loop(0, n_iter, body, (ang0, jnp.zeros_like(ang0)))

    # Final ISTFT with the converged phases; output the center-trimmed waveform rows.
    z2d = istft_rows(mag2 * ang_final)
    out_ref[...] = z2d[pr:pr + t - 1, :]                                   # (t-1, hop)


# ---------------------------------------------------------------------------
# Host-side (numpy) constant construction.
# ---------------------------------------------------------------------------
def _hann_window(n):
    i = np.arange(n, dtype=np.float64)
    return 0.5 - 0.5 * np.cos(2.0 * np.pi * i / n)          # periodic (torch default)


def _hz_to_mel(f):
    return 2595.0 * np.log10(1.0 + f / 700.0)


def _mel_to_hz(m):
    return 700.0 * (10.0 ** (m / 2595.0) - 1.0)


def _melscale_fbanks(n_freqs, f_min, f_max, n_mels, sample_rate):
    # torchaudio.functional.melscale_fbanks (norm=None, mel_scale="htk")
    all_freqs = np.linspace(0.0, sample_rate // 2, n_freqs)
    m_pts = np.linspace(_hz_to_mel(f_min), _hz_to_mel(f_max), n_mels + 2)
    f_pts = _mel_to_hz(m_pts)
    f_diff = f_pts[1:] - f_pts[:-1]
    slopes = f_pts[None, :] - all_freqs[:, None]
    down = -slopes[:, :-2] / f_diff[:-1]
    up = slopes[:, 2:] / f_diff[1:]
    return np.maximum(0.0, np.minimum(down, up))            # (n_freqs, n_mels)


def _make_bases_padded(n_fft, win, f_pad):
    f_bins = n_fft // 2 + 1
    n = np.arange(n_fft, dtype=np.float64)[:, None]
    f = np.arange(f_bins, dtype=np.float64)[None, :]
    ang = 2.0 * np.pi * f * n / n_fft                       # (n_fft, f_bins)
    # forward (STFT) basis, analysis window folded in, lane-padded: (n_fft, 2*f_pad)
    fwd = np.zeros((n_fft, 2 * f_pad), np.float64)
    fwd[:, :f_bins] = np.cos(ang) * win[:, None]
    fwd[:, f_pad:f_pad + f_bins] = -np.sin(ang) * win[:, None]
    # one-sided irfft weights (imag parts of DC / Nyquist ignored, like irfft)
    c = np.full((f_bins,), 2.0 / n_fft, np.float64)
    c[0] = 1.0 / n_fft
    c[-1] = 1.0 / n_fft
    s = c.copy()
    s[0] = 0.0
    s[-1] = 0.0
    # inverse basis, stacked [re ; im] along K, window folded in: (2*f_pad, n_fft)
    inv = np.zeros((2 * f_pad, n_fft), np.float64)
    inv[:f_bins, :] = (c[:, None] * np.cos(ang.T)) * win[None, :]
    inv[f_pad:f_pad + f_bins, :] = (-s[:, None] * np.sin(ang.T)) * win[None, :]
    return fwd.astype(np.float32), inv.astype(np.float32)


def _reflection_lane_ops(hop):
    # Lane-permutation operators implementing the offset-by-one reflection inside a hop.
    e_first = np.zeros((hop, hop), np.float64)
    e_first[0, 0] = 1.0
    m_head = np.zeros((hop, hop), np.float64)
    for l in range(1, hop):
        m_head[l, hop - l] = 1.0
    m_tail = np.zeros((hop, hop), np.float64)
    for l in range(hop - 1):
        m_tail[l, hop - 2 - l] = 1.0
    e_last = np.zeros((hop, hop), np.float64)
    e_last[hop - 1, hop - 1] = 1.0
    head_op = np.concatenate([e_first, m_head], axis=0).astype(np.float32)
    tail_op = np.concatenate([m_tail, e_last], axis=0).astype(np.float32)
    return head_op, tail_op


def _time_dependent_constants(t, n_fft, hop, win):
    r_blk = n_fft // hop
    pr = (n_fft // 2) // hop
    n_rows = t - 1 + r_blk
    # NOLA window envelope (hoisted out of the GL loop), stored as its reciprocal.
    win_sq = (win * win).astype(np.float64)
    env = np.zeros((n_rows * hop,), np.float64)
    for fr in range(t):
        env[fr * hop: fr * hop + n_fft] += win_sq
    inv_env = (1.0 / np.maximum(env, 1e-11)).reshape(n_rows, hop).astype(np.float32)
    # Overlap-add shift operators: ola = sum_r shift[:, r*t:(r+1)*t] @ frames[:, r*hop:(r+1)*hop]
    shift = np.zeros((n_rows, r_blk * t), np.float32)
    for r in range(r_blk):
        shift[np.arange(t) + r, r * t + np.arange(t)] = 1.0
    # Row selectors feeding the reflect-pad boundary rows.
    sel = np.zeros((4 * pr, n_rows), np.float32)
    for k in range(pr):
        sel[k, r_blk - k] = 1.0
        sel[pr + k, r_blk - 1 - k] = 1.0
        sel[2 * pr + k, t + pr - 2 - k] = 1.0
        sel[3 * pr + k, t + pr - 3 - k] = 1.0
    return inv_env, shift, sel


# ---------------------------------------------------------------------------
# GL_rec module.
# ---------------------------------------------------------------------------
class GLRec:
    """InverseMelScale -> GriffinLim, fused into a single Pallas TPU kernel."""

    def __init__(self, n_fft=64, win_length=64, hop_length=16, n_mels=8,
                 min_freq=90.0, max_freq=7600.0, sample_rate=16000,
                 n_iter=32, power=2.0, momentum=0.99):
        assert win_length == n_fft              # module always uses win_length == n_fft
        assert n_fft % hop_length == 0 and (n_fft // 2) % hop_length == 0
        self.n_fft = n_fft
        self.hop = hop_length
        self.n_iter = n_iter
        self.power = power
        self.momentum = momentum / (1.0 + momentum)
        self.f_bins = n_fft // 2 + 1
        self.f_pad = ((self.f_bins + 63) // 64) * 64      # lane-friendly padded bins

        # NB: the PyTorch module passes n_stft = n_fft (not n_fft//2+1) to InverseMelScale
        # and slices afterwards; mirror that quirk (pinv built on all n_fft bins, then
        # only one-sided rows kept by slicing pinv's columns at init).
        fb = _melscale_fbanks(n_fft, min_freq, max_freq, n_mels, sample_rate)
        pinv_t = np.linalg.pinv(fb.T).T                   # (n_mels, n_fft) min-norm lstsq
        pp = np.zeros((n_mels, self.f_pad), np.float32)
        pp[:, :self.f_bins] = pinv_t[:, :self.f_bins]
        self.pinv_t_pad = jnp.asarray(pp)

        self.win = _hann_window(win_length)
        fwd, inv = _make_bases_padded(n_fft, self.win, self.f_pad)
        self.fwd_basis = jnp.asarray(fwd)
        self.inv_basis = jnp.asarray(inv)
        head_op, tail_op = _reflection_lane_ops(hop_length)
        self.head_op = jnp.asarray(head_op)
        self.tail_op = jnp.asarray(tail_op)

        self._forward = jax.jit(self._forward_impl)

    def _forward_impl(self, mel_spect, key):
        # mel_spect: (n_mels, T) power mel spectrogram (PyTorch layout).
        _, t = mel_spect.shape
        assert t >= (self.n_fft // 2) // self.hop + 2
        mel_t = jnp.transpose(mel_spect).astype(jnp.float32)          # (T, n_mels)

        inv_env, shift, sel = _time_dependent_constants(t, self.n_fft, self.hop, self.win)

        # torch.rand complex phase init, in the lane-padded stacked [re | im] layout.
        k1, k2 = jax.random.split(key)
        a_re = jax.random.uniform(k1, (t, self.f_bins), jnp.float32)
        a_im = jax.random.uniform(k2, (t, self.f_bins), jnp.float32)
        ang0 = jnp.zeros((t, 2 * self.f_pad), jnp.float32)
        ang0 = ang0.at[:, :self.f_bins].set(a_re)
        ang0 = ang0.at[:, self.f_pad:self.f_pad + self.f_bins].set(a_im)

        # TODO(synk): print_spect / matplotlib plotting and the shape prints are
        # host-side side effects in the reference module and are skipped.
        kern = functools.partial(gl_fused_kernel, n_iter=self.n_iter,
                                 momentum=self.momentum, power=self.power)
        y2d = pl.pallas_call(
            kern,
            out_shape=jax.ShapeDtypeStruct((t - 1, self.hop), jnp.float32),
            in_specs=_vmem(10),
            out_specs=pl.BlockSpec(memory_space=VMEM),
        )(mel_t, self.pinv_t_pad, ang0, self.fwd_basis, self.inv_basis,
          jnp.asarray(inv_env), jnp.asarray(shift), jnp.asarray(sel),
          self.head_op, self.tail_op)
        return y2d.reshape(-1)                                         # (hop * (T-1),)

    def __call__(self, mel_spect, key):
        return self._forward(mel_spect, key)


# ---------------------------------------------------------------------------
# demo
# ---------------------------------------------------------------------------
if __name__ == "__main__":
    N_FFT, WIN, HOP, N_MELS, T = 64, 64, 16, 8, 16
    model = GLRec(n_fft=N_FFT, win_length=WIN, hop_length=HOP, n_mels=N_MELS,
                  min_freq=90.0, max_freq=7600.0, sample_rate=16000, n_iter=32)

    key = jax.random.PRNGKey(0)
    k_mel, k_phase = jax.random.split(key)
    # power mel spectrogram (non-negative), PyTorch (n_mels, time) layout
    mel = jax.random.uniform(k_mel, (N_MELS, T), jnp.float32) * 4.0

    wave = model(mel, k_phase)
    wave = jax.block_until_ready(wave)

    assert wave.shape == (HOP * (T - 1),)
    assert bool(jnp.all(jnp.isfinite(wave)))
    print("KERNEL_OK")
</pallas_src>

<mosaic_0001>
module attributes {stable_mosaic.version = 11 : i64} {
  func.func @gl_fused_kernel(%arg0: memref<16x8xf32, #tpu.memory_space<vmem>>, %arg1: memref<8x64xf32, #tpu.memory_space<vmem>>, %arg2: memref<16x128xf32, #tpu.memory_space<vmem>>, %arg3: memref<64x128xf32, #tpu.memory_space<vmem>>, %arg4: memref<128x64xf32, #tpu.memory_space<vmem>>, %arg5: memref<19x16xf32, #tpu.memory_space<vmem>>, %arg6: memref<19x64xf32, #tpu.memory_space<vmem>>, %arg7: memref<8x19xf32, #tpu.memory_space<vmem>>, %arg8: memref<32x16xf32, #tpu.memory_space<vmem>>, %arg9: memref<32x16xf32, #tpu.memory_space<vmem>>, %arg10: memref<15x16xf32, #tpu.memory_space<vmem>>) attributes {dimension_semantics = [], scalar_prefetch = 0 : i64, scratch_operands = 0 : i64, tpu.core_type = #tpu.core_type<tc>} {
    %c0 = arith.constant 0 : index
    %c0_0 = arith.constant 0 : index
    %0 = vector.load %arg0[%c0, %c0_0] : memref<16x8xf32, #tpu.memory_space<vmem>>, vector<16x8xf32>
    %c0_1 = arith.constant 0 : index
    %c0_2 = arith.constant 0 : index
    %1 = vector.load %arg1[%c0_1, %c0_2] : memref<8x64xf32, #tpu.memory_space<vmem>>, vector<8x64xf32>
    %cst = arith.constant dense<0.000000e+00> : vector<16x64xf32>
    %2 = tpu.matmul %0, %1, %cst {dimension_numbers = #tpu.dot_dimension_numbers<[1], [0], [0], [1], [0, 0, 1, 1], [], []>} : vector<16x8xf32>, vector<8x64xf32>, vector<16x64xf32> -> vector<16x64xf32>
    %cst_3 = arith.constant 0.000000e+00 : f32
    %3 = vector.broadcast %cst_3 : f32 to vector<16x64xf32>
    %4 = arith.maximumf %2, %3 : vector<16x64xf32>
    %5 = math.sqrt %4 : vector<16x64xf32>
    %6 = tpu.concatenate %5, %5 in 1 : vector<16x64xf32>, vector<16x64xf32> -> vector<16x128xf32>
    %c0_4 = arith.constant 0 : index
    %c0_5 = arith.constant 0 : index
    %7 = vector.load %arg3[%c0_4, %c0_5] : memref<64x128xf32, #tpu.memory_space<vmem>>, vector<64x128xf32>
    %c0_6 = arith.constant 0 : index
    %c0_7 = arith.constant 0 : index
    %8 = vector.load %arg4[%c0_6, %c0_7] : memref<128x64xf32, #tpu.memory_space<vmem>>, vector<128x64xf32>
    %c0_8 = arith.constant 0 : index
    %c0_9 = arith.constant 0 : index
    %9 = vector.load %arg5[%c0_8, %c0_9] : memref<19x16xf32, #tpu.memory_space<vmem>>, vector<19x16xf32>
    %c0_10 = arith.constant 0 : index
    %c0_11 = arith.constant 0 : index
    %10 = vector.load %arg6[%c0_10, %c0_11] : memref<19x64xf32, #tpu.memory_space<vmem>>, vector<19x64xf32>
    %c0_12 = arith.constant 0 : index
    %c0_13 = arith.constant 0 : index
    %11 = vector.load %arg7[%c0_12, %c0_13] : memref<8x19xf32, #tpu.memory_space<vmem>>, vector<8x19xf32>
    %c0_14 = arith.constant 0 : index
    %c0_15 = arith.constant 0 : index
    %12 = vector.load %arg8[%c0_14, %c0_15] : memref<32x16xf32, #tpu.memory_space<vmem>>, vector<32x16xf32>
    %c0_16 = arith.constant 0 : index
    %c0_17 = arith.constant 0 : index
    %13 = vector.load %arg9[%c0_16, %c0_17] : memref<32x16xf32, #tpu.memory_space<vmem>>, vector<32x16xf32>
    %c0_18 = arith.constant 0 : index
    %c0_19 = arith.constant 0 : index
    %14 = vector.load %arg2[%c0_18, %c0_19] : memref<16x128xf32, #tpu.memory_space<vmem>>, vector<16x128xf32>
    %cst_20 = arith.constant 0.000000e+00 : f32
    %15 = vector.broadcast %cst_20 : f32 to vector<16x128xf32>
    %c0_i32 = arith.constant 0 : i32
    %c32_i32 = arith.constant 32 : i32
    %16 = arith.addi %c0_i32, %c32_i32 : i32
    %c1_i32 = arith.constant 1 : i32
    %17:2 = scf.for %arg11 = %c0_i32 to %16 step %c1_i32 iter_args(%arg12 = %14, %arg13 = %15) -> (vector<16x128xf32>, vector<16x128xf32>)  : i32 {
      %38 = arith.mulf %6, %arg12 : vector<16x128xf32>
      %cst_28 = arith.constant dense<0.000000e+00> : vector<16x64xf32>
      %39 = tpu.matmul %38, %8, %cst_28 {dimension_numbers = #tpu.dot_dimension_numbers<[1], [0], [0], [1], [0, 0, 1, 1], [], []>} : vector<16x128xf32>, vector<128x64xf32>, vector<16x64xf32> -> vector<16x64xf32>
      %40 = vector.extract_strided_slice %10 {offsets = [0, 0], sizes = [19, 16], strides = [1, 1]} : vector<19x64xf32> to vector<19x16xf32>
      %41 = vector.extract_strided_slice %39 {offsets = [0, 0], sizes = [16, 16], strides = [1, 1]} : vector<16x64xf32> to vector<16x16xf32>
      %cst_29 = arith.constant dense<0.000000e+00> : vector<19x16xf32>
      %42 = tpu.matmul %40, %41, %cst_29 {dimension_numbers = #tpu.dot_dimension_numbers<[1], [0], [0], [1], [0, 0, 1, 1], [], []>} : vector<19x16xf32>, vector<16x16xf32>, vector<19x16xf32> -> vector<19x16xf32>
      %43 = vector.extract_strided_slice %10 {offsets = [0, 16], sizes = [19, 16], strides = [1, 1]} : vector<19x64xf32> to vector<19x16xf32>
      %44 = vector.extract_strided_slice %39 {offsets = [0, 16], sizes = [16, 16], strides = [1, 1]} : vector<16x64xf32> to vector<16x16xf32>
      %cst_30 = arith.constant dense<0.000000e+00> : vector<19x16xf32>
      %45 = tpu.matmul %43, %44, %cst_30 {dimension_numbers = #tpu.dot_dimension_numbers<[1], [0], [0], [1], [0, 0, 1, 1], [], []>} : vector<19x16xf32>, vector<16x16xf32>, vector<19x16xf32> -> vector<19x16xf32>
      %46 = arith.addf %42, %45 : vector<19x16xf32>
      %47 = vector.extract_strided_slice %10 {offsets = [0, 32], sizes = [19, 16], strides = [1, 1]} : vector<19x64xf32> to vector<19x16xf32>
      %48 = vector.extract_strided_slice %39 {offsets = [0, 32], sizes = [16, 16], strides = [1, 1]} : vector<16x64xf32> to vector<16x16xf32>
      %cst_31 = arith.constant dense<0.000000e+00> : vector<19x16xf32>
      %49 = tpu.matmul %47, %48, %cst_31 {dimension_numbers = #tpu.dot_dimension_numbers<[1], [0], [0], [1], [0, 0, 1, 1], [], []>} : vector<19x16xf32>, vector<16x16xf32>, vector<19x16xf32> -> vector<19x16xf32>
      %50 = arith.addf %46, %49 : vector<19x16xf32>
      %51 = vector.extract_strided_slice %10 {offsets = [0, 48], sizes = [19, 16], strides = [1, 1]} : vector<19x64xf32> to vector<19x16xf32>
      %52 = vector.extract_strided_slice %39 {offsets = [0, 48], sizes = [16, 16], strides = [1, 1]} : vector<16x64xf32> to vector<16x16xf32>
      %cst_32 = arith.constant dense<0.000000e+00> : vector<19x16xf32>
      %53 = tpu.matmul %51, %52, %cst_32 {dimension_numbers = #tpu.dot_dimension_numbers<[1], [0], [0], [1], [0, 0, 1, 1], [], []>} : vector<19x16xf32>, vector<16x16xf32>, vector<19x16xf32> -> vector<19x16xf32>
      %54 = arith.addf %50, %53 : vector<19x16xf32>
      %55 = arith.mulf %54, %9 : vector<19x16xf32>
      %cst_33 = arith.constant dense<0.000000e+00> : vector<8x16xf32>
      %56 = tpu.matmul %11, %55, %cst_33 {dimension_numbers = #tpu.dot_dimension_numbers<[1], [0], [0], [1], [0, 0, 1, 1], [], []>} : vector<8x19xf32>, vector<19x16xf32>, vector<8x16xf32> -> vector<8x16xf32>
      %57 = vector.extract_strided_slice %56 {offsets = [0, 0], sizes = [2, 16], strides = [1, 1]} : vector<8x16xf32> to vector<2x16xf32>
      %58 = vector.extract_strided_slice %56 {offsets = [2, 0], sizes = [2, 16], strides = [1, 1]} : vector<8x16xf32> to vector<2x16xf32>
      %59 = tpu.concatenate %57, %58 in 1 : vector<2x16xf32>, vector<2x16xf32> -> vector<2x32xf32>
      %cst_34 = arith.constant dense<0.000000e+00> : vector<2x16xf32>
      %60 = tpu.matmul %59, %12, %cst_34 {dimension_numbers = #tpu.dot_dimension_numbers<[1], [0], [0], [1], [0, 0, 1, 1], [], []>} : vector<2x32xf32>, vector<32x16xf32>, vector<2x16xf32> -> vector<2x16xf32>
      %61 = vector.extract_strided_slice %56 {offsets = [4, 0], sizes = [2, 16], strides = [1, 1]} : vector<8x16xf32> to vector<2x16xf32>
      %62 = vector.extract_strided_slice %56 {offsets = [6, 0], sizes = [2, 16], strides = [1, 1]} : vector<8x16xf32> to vector<2x16xf32>
      %63 = tpu.concatenate %61, %62 in 1 : vector<2x16xf32>, vector<2x16xf32> -> vector<2x32xf32>
      %cst_35 = arith.constant dense<0.000000e+00> : vector<2x16xf32>
      %64 = tpu.matmul %63, %13, %cst_35 {dimension_numbers = #tpu.dot_dimension_numbers<[1], [0], [0], [1], [0, 0, 1, 1], [], []>} : vector<2x32xf32>, vector<32x16xf32>, vector<2x16xf32> -> vector<2x16xf32>
      %65 = vector.extract_strided_slice %55 {offsets = [2, 0], sizes = [15, 16], strides = [1, 1]} : vector<19x16xf32> to vector<15x16xf32>
      %66 = tpu.concatenate %60, %65, %64 in 0 : vector<2x16xf32>, vector<15x16xf32>, vector<2x16xf32> -> vector<19x16xf32>
      %67 = vector.extract_strided_slice %66 {offsets = [0, 0], sizes = [16, 16], strides = [1, 1]} : vector<19x16xf32> to vector<16x16xf32>
      %68 = vector.extract_strided_slice %66 {offsets = [1, 0], sizes = [16, 16], strides = [1, 1]} : vector<19x16xf32> to vector<16x16xf32>
      %69 = vector.extract_strided_slice %66 {offsets = [2, 0], sizes = [16, 16], strides = [1, 1]} : vector<19x16xf32> to vector<16x16xf32>
      %70 = vector.extract_strided_slice %66 {offsets = [3, 0], sizes = [16, 16], strides = [1, 1]} : vector<19x16xf32> to vector<16x16xf32>
      %71 = tpu.concatenate %67, %68, %69, %70 in 1 : vector<16x16xf32>, vector<16x16xf32>, vector<16x16xf32>, vector<16x16xf32> -> vector<16x64xf32>
      %cst_36 = arith.constant dense<0.000000e+00> : vector<16x128xf32>
      %72 = tpu.matmul %71, %7, %cst_36 {dimension_numbers = #tpu.dot_dimension_numbers<[1], [0], [0], [1], [0, 0, 1, 1], [], []>} : vector<16x64xf32>, vector<64x128xf32>, vector<16x128xf32> -> vector<16x128xf32>
      %cst_37 = arith.constant 0.497487426 : f32
      %73 = vector.broadcast %cst_37 : f32 to vector<16x128xf32>
      %74 = arith.mulf %73, %arg13 : vector<16x128xf32>
      %75 = arith.subf %72, %74 : vector<16x128xf32>
      %76 = vector.extract_strided_slice %75 {offsets = [0, 0], sizes = [16, 64], strides = [1, 1]} : vector<16x128xf32> to vector<16x64xf32>
      %77 = vector.extract_strided_slice %75 {offsets = [0, 64], sizes = [16, 64], strides = [1, 1]} : vector<16x128xf32> to vector<16x64xf32>
      %78 = arith.mulf %76, %76 : vector<16x64xf32>
      %79 = arith.mulf %77, %77 : vector<16x64xf32>
      %80 = arith.addf %78, %79 : vector<16x64xf32>
      %cst_38 = arith.constant 1.000000e-16 : f32
      %81 = vector.broadcast %cst_38 : f32 to vector<16x64xf32>
      %82 = arith.addf %80, %81 : vector<16x64xf32>
      %83 = math.rsqrt %82 : vector<16x64xf32>
      %84 = arith.mulf %76, %83 : vector<16x64xf32>
      %85 = arith.mulf %77, %83 : vector<16x64xf32>
      %86 = tpu.concatenate %84, %85 in 1 : vector<16x64xf32>, vector<16x64xf32> -> vector<16x128xf32>
      scf.yield %86, %72 : vector<16x128xf32>, vector<16x128xf32>
    }
    %18 = arith.mulf %6, %17#0 : vector<16x128xf32>
    %cst_21 = arith.constant dense<0.000000e+00> : vector<16x64xf32>
    %19 = tpu.matmul %18, %8, %cst_21 {dimension_numbers = #tpu.dot_dimension_numbers<[1], [0], [0], [1], [0, 0, 1, 1], [], []>} : vector<16x128xf32>, vector<128x64xf32>, vector<16x64xf32> -> vector<16x64xf32>
    %20 = vector.extract_strided_slice %10 {offsets = [0, 0], sizes = [19, 16], strides = [1, 1]} : vector<19x64xf32> to vector<19x16xf32>
    %21 = vector.extract_strided_slice %19 {offsets = [0, 0], sizes = [16, 16], strides = [1, 1]} : vector<16x64xf32> to vector<16x16xf32>
    %cst_22 = arith.constant dense<0.000000e+00> : vector<19x16xf32>
    %22 = tpu.matmul %20, %21, %cst_22 {dimension_numbers = #tpu.dot_dimension_numbers<[1], [0], [0], [1], [0, 0, 1, 1], [], []>} : vector<19x16xf32>, vector<16x16xf32>, vector<19x16xf32> -> vector<19x16xf32>
    %23 = vector.extract_strided_slice %10 {offsets = [0, 16], sizes = [19, 16], strides = [1, 1]} : vector<19x64xf32> to vector<19x16xf32>
    %24 = vector.extract_strided_slice %19 {offsets = [0, 16], sizes = [16, 16], strides = [1, 1]} : vector<16x64xf32> to vector<16x16xf32>
    %cst_23 = arith.constant dense<0.000000e+00> : vector<19x16xf32>
    %25 = tpu.matmul %23, %24, %cst_23 {dimension_numbers = #tpu.dot_dimension_numbers<[1], [0], [0], [1], [0, 0, 1, 1], [], []>} : vector<19x16xf32>, vector<16x16xf32>, vector<19x16xf32> -> vector<19x16xf32>
    %26 = arith.addf %22, %25 : vector<19x16xf32>
    %27 = vector.extract_strided_slice %10 {offsets = [0, 32], sizes = [19, 16], strides = [1, 1]} : vector<19x64xf32> to vector<19x16xf32>
    %28 = vector.extract_strided_slice %19 {offsets = [0, 32], sizes = [16, 16], strides = [1, 1]} : vector<16x64xf32> to vector<16x16xf32>
    %cst_24 = arith.constant dense<0.000000e+00> : vector<19x16xf32>
    %29 = tpu.matmul %27, %28, %cst_24 {dimension_numbers = #tpu.dot_dimension_numbers<[1], [0], [0], [1], [0, 0, 1, 1], [], []>} : vector<19x16xf32>, vector<16x16xf32>, vector<19x16xf32> -> vector<19x16xf32>
    %30 = arith.addf %26, %29 : vector<19x16xf32>
    %31 = vector.extract_strided_slice %10 {offsets = [0, 48], sizes = [19, 16], strides = [1, 1]} : vector<19x64xf32> to vector<19x16xf32>
    %32 = vector.extract_strided_slice %19 {offsets = [0, 48], sizes = [16, 16], strides = [1, 1]} : vector<16x64xf32> to vector<16x16xf32>
    %cst_25 = arith.constant dense<0.000000e+00> : vector<19x16xf32>
    %33 = tpu.matmul %31, %32, %cst_25 {dimension_numbers = #tpu.dot_dimension_numbers<[1], [0], [0], [1], [0, 0, 1, 1], [], []>} : vector<19x16xf32>, vector<16x16xf32>, vector<19x16xf32> -> vector<19x16xf32>
    %34 = arith.addf %30, %33 : vector<19x16xf32>
    %35 = arith.mulf %34, %9 : vector<19x16xf32>
    %36 = vector.extract_strided_slice %35 {offsets = [2, 0], sizes = [15, 16], strides = [1, 1]} : vector<19x16xf32> to vector<15x16xf32>
    %c0_26 = arith.constant 0 : index
    %c0_27 = arith.constant 0 : index
    %37 = vector.load %arg10[%c0_26, %c0_27] : memref<15x16xf32, #tpu.memory_space<vmem>>, vector<15x16xf32>
    tpu.vector_store %arg10[%c0_26, %c0_27], %36 {strides = array<i32>} : memref<15x16xf32, #tpu.memory_space<vmem>>, vector<15x16xf32>,
    return
  }
}

</mosaic_0001>

<bundles_post_ra>
// kernel: _forward_impl.1
= control target key start
LH: loop header
LB: loop body
LE: loop exit
PB: predicated region body
PF: predicated region fallthrough
CT: control target
= control target key end

     0   :  { %15 = vsyncpa [#allocation3], 0  ;;  %s2890_s0 = inlined_call_operand.vmem [shape: f32[16,8], index: 0, kind: input, shape index: {}]   ;;  %s2891_s1 = inlined_call_operand.hbm [shape: f32[8,64], index: 1, kind: input, shape index: {}]   ;;  %s2892_s2 = inlined_call_operand.vmem [shape: f32[16,128], index: 2, kind: input, shape index: {}]   ;;  %s2893_s3 = inlined_call_operand.vmem [shape: f32[64,128], index: 3, kind: input, shape index: {}]   ;;  %s2894_s4 = inlined_call_operand.vmem [shape: f32[128,64], index: 4, kind: input, shape index: {}]   ;;  %s2895_s5 = inlined_call_operand.vmem [shape: f32[19,16], index: 5, kind: input, shape index: {}]   ;;  %s2896_s6 = inlined_call_operand.hbm [shape: f32[19,64], index: 6, kind: input, shape index: {}]   ;;  %s2897_s7 = inlined_call_operand.vmem [shape: f32[8,19], index: 7, kind: input, shape index: {}]   ;;  %s2898_s8 = inlined_call_operand.vmem [shape: f32[32,16], index: 8, kind: input, shape index: {}]   ;;  %s2899_s9 = inlined_call_operand.vmem [shape: f32[32,16], index: 9, kind: input, shape index: {}]   ;;  %s2900_s10 = inlined_call_operand.vmem [shape: f32[15,16], index: 10, kind: output, shape index: {}]  }
   0x1   :  { %16 = vsyncpa [#allocation5], 0  ;;  %s2301_s13 = smov [#allocation2]   ;;  %s2302_s15 = smov [#allocation4]  }
   0x2   :  { %s25_s14 = sshll.u32 %s2301_s13, 4  ;;  %s42_s16 = sshll.u32 %s2302_s15, 4  ;;  %s26_s14 = int_to_ptr.vmem [resolvable:$true] %s25_s14  ;;  %s2377_s16 = int_to_ptr.vmem [resolvable:$true] %s42_s16 }
   0x3   :  { %s2213_s19 = scalar_lea.hbm %s2891_s1, 128 }
   0x4   :  { %p2214_p0 = scmp.ne.s32.totalorder %s2891_s1, %s2213_s19  ;;  %p2217_p1 = scmp.lt.u32.totalorder %s2213_s19, %s2891_s1 }
   0x6   :  { %p2219_p2 = pnand %p2217_p1, %p2214_p0 }
   0x8   :  { %2222 = shalt.err (!%p2219_p2)
}
   0x9   :  { %s2223_s24 = scalar_lea.vmem %s26_s14, 128  ;;  %p2228_p4 = scmp.lt.s32.totalorder %s26_s14, %s26_s14 }
   0xa   :  { %p2224_p3 = scmp.ne.s32.totalorder %s26_s14, %s2223_s24  ;;  %p2229_p5 = scmp.lt.s32.totalorder %s2223_s24, %s2223_s24 }
   0xc   :  { %p2230_p6 = por %p2229_p5, %p2228_p4 }
   0xe   :  { %p2231_p7 = pnand %p2230_p6, %p2224_p3 }
  0x10   :  { %2234 = shalt.err (!%p2231_p7)
}
  0x11   :  { %28 = dma.hbm_to_vmem [thread:$0]  %s2891_s1, 128, %s26_s14, [#allocation3]  }
  0x12   :  { %s2235_s29 = scalar_lea.hbm %s2896_s6, 384 }
  0x13   :  { %p2236_p8 = scmp.ne.s32.totalorder %s2896_s6, %s2235_s29  ;;  %p2239_p9 = scmp.lt.u32.totalorder %s2235_s29, %s2896_s6 }
  0x15   :  { %p2241_p10 = pnand %p2239_p9, %p2236_p8 }
  0x17   :  { %2244 = shalt.err (!%p2241_p10)
}
  0x18   :  { %s2245_s15 = scalar_lea.vmem %s2377_s16, 384  ;;  %p2250_p12 = scmp.lt.s32.totalorder %s2377_s16, %s2377_s16 }
  0x19   :  { %p2246_p11 = scmp.ne.s32.totalorder %s2377_s16, %s2245_s15  ;;  %p2251_p13 = scmp.lt.s32.totalorder %s2245_s15, %s2245_s15 }
  0x1b   :  { %p2252_p0 = por %p2251_p13, %p2250_p12 }
  0x1d   :  { %p2253_p1 = pnand %p2252_p0, %p2246_p11 }
  0x1f   :  { %2256 = shalt.err (!%p2253_p1)
}
  0x20   :  { %s2303_s1 = smov 128   ;;  %s2304_s14 = smov 8  }
  0x21   :  { %48 = dma.hbm_to_vmem [thread:$0]  %s2896_s6, 384, %s2377_s16, [#allocation5], %s2303_s1, %s2303_s1, %s2304_s14  }
  0x22   :  { %2277 = dma.done.wait [#allocation3], 128  }
  0x23   :  { %2278 = vsyncadd [#allocation3], 4294967168 }
  0x24   :  { %2279 = dma.done.wait [#allocation5], 384  }
  0x25   :  { %2280 = vsyncadd [#allocation5], 4294966912  ;;  %v2411_v0 = vld [vmem:[%s2893_s3] sm:$0xff]  ;;  %v2416_v1 = vld [vmem:[%s2893_s3 + $0x8] sm:$0xff]  ;;  %vm64_vm0 = vcmask 64512   ;;  %vm170_vm5 = vcmask 523264  }
  0x26   :  { %2901 = vst [vmem:[#allocation8_spill] sm:$0xff] %v2411_v0  ;;  %2902 = vst [vmem:[#allocation9_spill] sm:$0xff] %v2416_v1  ;;  %v2421_v2 = vld [vmem:[%s2893_s3 + $0x10] sm:$0xff]  ;;  %v2426_v3 = vld [vmem:[%s2893_s3 + $0x18] sm:$0xff]  ;;  %v2612_v62 = vmov 0.0   ;;  %v2614_v63 = vmov 0.0  }
  0x27   :  { %2903 = vst [vmem:[#allocation10_spill] sm:$0xff] %v2421_v2  ;;  %2904 = vst [vmem:[#allocation11_spill] sm:$0xff] %v2426_v3  ;;  %v2431_v4 = vld [vmem:[%s2893_s3 + $0x20] sm:$0xff]  ;;  %v2436_v5 = vld [vmem:[%s2893_s3 + $0x28] sm:$0xff] }
  0x28   :  { %2905 = vst [vmem:[#allocation12_spill] sm:$0xff] %v2431_v4  ;;  %2906 = vst [vmem:[#allocation13_spill] sm:$0xff] %v2436_v5  ;;  %v2441_v6 = vld [vmem:[%s2893_s3 + $0x30] sm:$0xff]  ;;  %v2446_v7 = vld [vmem:[%s2893_s3 + $0x38] sm:$0xff] }
  0x29   :  { %v2451_v8 = vld [vmem:[%s2894_s4] sm:$0xff]  ;;  %v2456_v9 = vld [vmem:[%s2894_s4 + $0x8] sm:$0xff]  ;;  %v2461_v10 = vld [vmem:[%s2894_s4 + $0x10] sm:$0xff] }
  0x2a   :  { %v2466_v11 = vld [vmem:[%s2894_s4 + $0x18] sm:$0xff]  ;;  %v2471_v12 = vld [vmem:[%s2894_s4 + $0x20] sm:$0xff]  ;;  %v2476_v13 = vld [vmem:[%s2894_s4 + $0x28] sm:$0xff] }
  0x2b   :  { %v2481_v14 = vld [vmem:[%s2894_s4 + $0x30] sm:$0xff]  ;;  %v2486_v15 = vld [vmem:[%s2894_s4 + $0x38] sm:$0xff]  ;;  %v2491_v16 = vld [vmem:[%s2894_s4 + $0x40] sm:$0xff] }
  0x2c   :  { %v2496_v17 = vld [vmem:[%s2894_s4 + $0x48] sm:$0xff]  ;;  %v2501_v18 = vld [vmem:[%s2894_s4 + $0x50] sm:$0xff]  ;;  %v2506_v19 = vld [vmem:[%s2894_s4 + $0x58] sm:$0xff] }
  0x2d   :  { %v2511_v20 = vld [vmem:[%s2894_s4 + $0x60] sm:$0xff]  ;;  %v2516_v21 = vld [vmem:[%s2894_s4 + $0x68] sm:$0xff]  ;;  %v2521_v22 = vld [vmem:[%s2894_s4 + $0x70] sm:$0xff] }
  0x2e   :  { %v2526_v23 = vld [vmem:[%s2894_s4 + $0x78] sm:$0xff]  ;;  %v2531_v24 = vld [vmem:[%s2895_s5] sm:$0xff]  ;;  %v2536_v25 = vld [vmem:[%s2895_s5 + $0x8] sm:$0xff] }
  0x2f   :  { %v2541_v26 = vld [vmem:[%s2895_s5 + $0x10] sm:$0x7]  ;;  %v2543_v27 = vld [vmem:[#allocation4] sm:$0xff]  ;;  %v2547_v29 = vld [vmem:[#allocation4 + $0x10] sm:$0x7] }
  0x30   :  { %v2545_v28 = vld [vmem:[#allocation4 + $0x8] sm:$0xff]  ;;  %v2552_v30 = vld [vmem:[%s2897_s7] sm:$0xff]  ;;  %v2562_v32 = vld [vmem:[%s2898_s8 + $0x8] sm:$0xff] }
  0x31   :  { %v2557_v31 = vld [vmem:[%s2898_s8] sm:$0xff]  ;;  %v2567_v33 = vld [vmem:[%s2898_s8 + $0x10] sm:$0xff]  ;;  %v2572_v34 = vld [vmem:[%s2898_s8 + $0x18] sm:$0xff] }
  0x32   :  { %v2577_v35 = vld [vmem:[%s2899_s9] sm:$0xff]  ;;  %v2582_v36 = vld [vmem:[%s2899_s9 + $0x8] sm:$0xff]  ;;  %v2587_v37 = vld [vmem:[%s2899_s9 + $0x10] sm:$0xff] }
  0x33   :  { %v2592_v38 = vld [vmem:[%s2899_s9 + $0x18] sm:$0xff]  ;;  %v212_v39 = vld [vmem:[%s2892_s2] sm:$0xff]   ;;  %v213_v40 = vld [vmem:[%s2892_s2 + $0x8] sm:$0xff]   ;;  %s2620_s2 = smov 0  }
  0x34   :  { %v63_v41 = vld [vmem:[#allocation2] sm:$0xff]  ;;  %v62_v43 = vld [vmem:[%s2890_s0 + $0x8] sm:$0xff] }
  0x35   :  { %1730 = vmatprep.subr.mxu0 %v63_v41  ;;  %v61_v42 = vld [vmem:[%s2890_s0] sm:$0xff]  ;;  %s2305_s0 = smov 64  }
  0x36   :  { %1731 = vmatpush3.msra.mxu0 %v63_v41  ;;  %1732 = vmatprep.mubr.msk.f32.mxu0 %vm64_vm0, %v61_v42 }
  0x37   :  { %1733 = vmatmul.mubr.msk.f32.vlgmr.msra.gmra.mrb[0].mxu0 %vm64_vm0, %v62_v43 }
 0x10a   :  { %v1734_v44 = vpop.f32.mrb[0].mxu0 }
 0x10b   :  { %v147_v45 = vmax.f32 %v1734_v44, 0.0  ;;  %v137_v46 = vpop.f32.mrb[1].mxu0 }
 0x10c   :  { %v146_v47 = vmax.f32 %v137_v46, 0.0 }
 0x10d   :  { %2175 = vrsqrt.f32 %v147_v45  ;;  %vm157_vm3 = vcmp.eq.f32.partialorder %v147_v45, inf  ;;  %v160_v56 = vand.u32 2147483648, %v147_v45  ;;  %vm159_vm4 = vcmp.eq.f32.partialorder %v147_v45, 0.0 }
 0x10e   :  { %2177 = vrsqrt.f32 %v146_v47  ;;  %vm150_vm1 = vcmp.eq.f32.partialorder %v146_v47, inf  ;;  %v153_v52 = vand.u32 2147483648, %v146_v47  ;;  %vm152_vm2 = vcmp.eq.f32.partialorder %v146_v47, 0.0 }
 0x117   :  { %v2176_v48 = vpop.eup %2175 }
 0x118   :  { %v2178_v49 = vpop.eup %2177  ;;  %v156_v51 = vmul.f32 %v2176_v48, %v147_v45 }
 0x119   :  { %v149_v50 = vmul.f32 %v2178_v49, %v146_v47 }
 0x11a   :  { %v158_v55 = vsel %vm157_vm3, %v147_v45, %v156_v51 }
 0x11b   :  { %v151_v53 = vsel %vm150_vm1, %v146_v47, %v149_v50  ;;  %v161_v57 = vsel %vm159_vm4, %v160_v56, %v158_v55 }
 0x11c   :  { %v154_v54 = vsel %vm152_vm2, %v153_v52, %v151_v53 }
 0x11d   :  { %164 = vrot.lane.b32.xlu0 %v154_v54, %s2305_s0 }
 0x121   :  { %166 = vrot.lane.b32.xlu0 %v161_v57, %s2305_s0 }
 0x18f   :  { %v165_v58 = vpop.permute.xlu0 %164 }
 0x190   :  { %v2607_v59 = vsel %vm170_vm5, %v154_v54, %v165_v58 }
 0x193   :  { %v167_v60 = vpop.permute.xlu0 %166 }
 0x194   :  { %v2610_v61 = vsel %vm170_vm5, %v161_v57, %v167_v60 }
 0x195 LB: > { %v2635_v41 = vpack.c.bf16 %v2456_v9, %v2451_v8  ;;  %v2639_v42 = vpack.c.bf16 %v2466_v11, %v2461_v10  ;;  %s2306_s9 = smov 112   ;;  %v2648_v43 = vpack.c.bf16 %v2476_v13, %v2471_v12  ;;  %v224_v44 = vmul.f32 %v2295_v39, %v2607_v59  ;;  %s2307_s16 = smov 96   ;;  %v2908_v0 = vld [vmem:[#allocation8_spill] sm:$0xff]  ;;  %v2909_v1 = vld [vmem:[#allocation9_spill] sm:$0xff]  ;;  %v2910_v2 = vld [vmem:[#allocation10_spill] sm:$0xff]  ;;  %s2299_s2 = sphi %s2620_s2, %s219_s2   ;;  %v2295_v39 = vphi %v212_v39, %v2915_v39   ;;  %v2291_v40 = vphi %v213_v40, %v2914_v40   ;;  %v2287_v63 = vphi %v2614_v63, %v1871_v63   ;;  %v2283_v62 = vphi %v2612_v62, %v1052_v62  }
 0x196   : > { %306 = vrot.lane.b32.xlu1 %v2545_v28, %s2306_s9  ;;  %v2657_v45 = vpack.c.bf16 %v2486_v15, %v2481_v14  ;;  %v2665_v39 = vpack.c.bf16 %v2496_v17, %v2491_v16  ;;  %v2671_v47 = vpack.c.bf16 %v2506_v19, %v2501_v18  ;;  %v2677_v48 = vpack.c.bf16 %v2516_v21, %v2511_v20  ;;  %s2311_s4 = smov 80   ;;  %s2312_s25 = smov 16   ;;  %v2911_v3 = vld [vmem:[#allocation11_spill] sm:$0xff]  ;;  %v2912_v4 = vld [vmem:[#allocation12_spill] sm:$0xff]  ;;  %v2913_v5 = vld [vmem:[#allocation13_spill] sm:$0xff] }
 0x197   : > { %1960 = vmatprep.subr.bf16.mxu0 %v2635_v41  ;;  %1767 = vmatprep.mubr.f32.mxu0 %v224_v44  ;;  %v2683_v49 = vpack.c.bf16 %v2526_v23, %v2521_v22  ;;  %v225_v50 = vmul.f32 %v2291_v40, %v2610_v61  ;;  %v2308_v51 = vmov 0.0|0.0   ;;  %vm2309_vm6 = vmmov 0   ;;  %s2313_s26 = smov 32   ;;  %s2314_s27 = smov 48  }
 0x198   : > { %1962 = vmatpush3.bf16.msra.mxu0 %v2635_v41  ;;  %v2907_v46 = vmov %v2665_v39  ;;  %1991 = vmatprep.subr.bf16.mxu1 %v2308_v51  ;;  %v2310_v52 = vmov 0.0   ;;  %vm318_vm7 = vcmask 130048   ;;  %vm700_vm8 = vcmask 1042432   ;;  %s2315_s28 = smov 64   ;;  %s219_s2 = sadd.s32 1, %s2299_s2  }
 0x199   : > { %1964 = vmatprep.subr.bf16.mxu0 %v2639_v42  ;;  %1774 = vmatprep.mubr.msk.f32.mxu1 %vm2309_vm6, %v2310_v52  ;;  %vm696_vm9 = vcmask 154624   ;;  %vm780_vm10 = vcmask 261120   ;;  %vm930_vm11 = vcmask 1041408   ;;  %vm937_vm12 = vcmask 1046528   ;;  %p216_p2 = scmp.ge.s32.totalorder %s219_s2, 32  }
 0x19a   : > { %308 = vrot.lane.b32.xlu1 %v2547_v29, %s2306_s9  ;;  %vm932_vm13 = vcmask 1040384   ;;  %vm949_vm14 = vcmask 1045504   ;;  %vm961_vm15 = vcmask 1044480   ;;  %vm977_vm0 = vcmask 392192   ;;  %s2319_s29 = smov (%p216_p2), 96   ;;  %s2320_s5 = smov (%p216_p2), 112  }
 0x19b   :  { %vm2317_vm1 = vmmov (%p216_p2), 0   ;;  %v2318_v8 = vmov (%p216_p2), 0.0   ;;  %s2321_s30 = smov (%p216_p2), 80   ;;  %vm1567_vm2 = vcmask (%p216_p2), 130050   ;;  %vm1570_vm3 = vcmask (%p216_p2), 122880  }
 0x19c   : > { %1966 = vmatpush3.bf16.msra.mxu0 %v2639_v42 }
 0x19d   : > { %1968 = vmatprep.subr.bf16.mxu0 %v2648_v43 }
 0x19e   : > { %491 = vrot.lane.b32.xlu1 %v2543_v27, %s2307_s16 }
 0x1a0   : > { %1970 = vmatpush3.bf16.msra.mxu0 %v2648_v43 }
 0x1a1   : > { %1972 = vmatprep.subr.bf16.mxu0 %v2657_v45 }
 0x1a4   : > { %1974 = vmatpush3.bf16.msra.mxu0 %v2657_v45 }
 0x1a5   : > { %1976 = vmatprep.subr.bf16.mxu0 %v2907_v46 }
 0x1a8   : > { %1978 = vmatpush3.bf16.msra.mxu0 %v2907_v46 }
 0x1a9   : > { %1980 = vmatprep.subr.bf16.mxu0 %v2671_v47 }
 0x1ac   : > { %1982 = vmatpush3.bf16.msra.mxu0 %v2671_v47 }
 0x1ad   : > { %1984 = vmatprep.subr.bf16.mxu0 %v2677_v48 }
 0x1b0   : > { %1986 = vmatpush3.bf16.msra.mxu0 %v2677_v48 }
 0x1b1   : > { %1988 = vmatprep.subr.bf16.mxu0 %v2683_v49 }
 0x1b4   : > { %1990 = vmatpush3.bf16.msra.mxu0 %v2683_v49 }
 0x1b5   : > { %2006 = vmatprep.subr.bf16.mxu0 %v2308_v51 }
 0x1b7   : > { %1768 = vmatmul.mubr.f32.vlgmr.msra.gmra.mrb[0].mxu0 %v225_v50 }
 0x1b8   : > { %1839 = vmatprep.mubr.msk.f32.mxu0 %vm2309_vm6, %v2310_v52 }
 0x208   : > { %v307_v44 = vpop.permute.xlu1 %306 }
 0x20c   : > { %v309_v50 = vpop.permute.xlu1 %308 }
 0x28a   : > { %v1769_v53 = vpop.f32.mrb[0].mxu0 }
 0x28b   : > { %v292_v54 = vpop.f32.mrb[1].mxu0 }
 0x28c   : > { %v1995_v55 = vpack.c.bf16 %v1769_v53, %v292_v54  ;;  %v2189_v40 = vpack.i.bf16 %v1769_v53, %v292_v54 }
 0x28e   : > { %2190 = vrot.lane.b32.xlu1 %v2189_v40, %s2311_s4  ;;  %2180 = vrot.lane.b32.xlu0 %v2189_v40, %s2306_s9 }
 0x292   : > { %304 = vrot.lane.b32.xlu0 %v2543_v27, %s2306_s9  ;;  %592 = vrot.lane.b32.xlu1 %v2543_v27, %s2311_s4 }
 0x296   : > { %2185 = vrot.lane.b32.xlu0 %v2189_v40, %s2307_s16  ;;  %596 = vrot.lane.b32.xlu1 %v2547_v29, %s2311_s4 }
 0x29a   : > { %493 = vrot.lane.b32.xlu0 %v2545_v28, %s2307_s16 }
 0x29e   : > { %495 = vrot.lane.b32.xlu0 %v2547_v29, %s2307_s16 }
 0x2a2   : > { %594 = vrot.lane.b32.xlu0 %v2545_v28, %s2311_s4 }
 0x300   : > { %v2181_v56 = vpop.permute.xlu0 %2180 }
 0x301   : > { %v2183_v57 = vunpack.i.h.bf16 %v2181_v56  ;;  %v2182_v58 = vunpack.i.l.bf16 %v2181_v56 }
 0x303   : > { %v1992_v60 = vpack.c.bf16 %v2183_v57, %v2182_v58 }
 0x304   : > { %v305_v39 = vpop.permute.xlu0 %304 }
 0x305   : > { %1993 = vmatpush3.bf16.msra.mxu1 %v1992_v60 }
 0x306   : > { %1994 = vmatprep.subr.bf16.mxu1 %v2308_v51 }
 0x308   : > { %1775 = vmatmul.mubr.msk.f32.vlgmr.msra.gmra.mrb[0].mxu1 %vm318_vm7, %v305_v39  ;;  %v2186_v53 = vpop.permute.xlu0 %2185 }
 0x309   : > { %1996 = vmatpush3.bf16.msra.mxu1 %v1995_v55  ;;  %1777 = vmatprep.mubr.msk.f32.mxu1 %vm2309_vm6, %v2310_v52  ;;  %v2188_v54 = vunpack.i.h.bf16 %v2186_v53  ;;  %v2187_v40 = vunpack.i.l.bf16 %v2186_v53  ;;  %v492_v55 = vpop.permute.xlu1 %491 }
 0x30a   : > { %1997 = vmatprep.subr.bf16.mxu1 %v2308_v51 }
 0x30b   : > { %v1998_v56 = vpack.c.bf16 %v2188_v54, %v2187_v40 }
 0x30c   : > { %1778 = vmatmul.mubr.msk.f32.gmra.mrb[2].mxu1 %vm318_vm7, %v307_v44  ;;  %v494_v39 = vpop.permute.xlu0 %493 }
 0x30d   : > { %1780 = vmatprep.mubr.msk.f32.mxu1 %vm2309_vm6, %v2310_v52  ;;  %v2191_v57 = vpop.permute.xlu1 %2190 }
 0x30e   : > { %v2193_v58 = vunpack.i.h.bf16 %v2191_v57  ;;  %v2192_v60 = vunpack.i.l.bf16 %v2191_v57 }
 0x310   : > { %1781 = vmatmul.mubr.msk.f32.gmra.mrb[4].mxu1 %vm318_vm7, %v309_v50  ;;  %v2001_v44 = vpack.c.bf16 %v2193_v58, %v2192_v60  ;;  %v496_v50 = vpop.permute.xlu0 %495 }
 0x311   : > { %1787 = vmatprep.mubr.msk.f32.mxu1 %vm2309_vm6, %v2310_v52  ;;  %v593_v53 = vpop.permute.xlu1 %592 }
 0x314   : > { %1788 = vmatmul.mubr.msk.f32.vlgmr.msra.gmra.mrb[0].mxu1 %vm318_vm7, %v2543_v27  ;;  %v595_v54 = vpop.permute.xlu0 %594 }
 0x315   : > { %1999 = vmatpush3.bf16.msra.mxu1 %v1998_v56  ;;  %1790 = vmatprep.mubr.msk.f32.mxu1 %vm2309_vm6, %v2310_v52  ;;  %v597_v40 = vpop.permute.xlu1 %596 }
 0x316   : > { %2000 = vmatprep.subr.bf16.mxu1 %v2308_v51 }
 0x318   : > { %1791 = vmatmul.mubr.msk.f32.gmra.mrb[2].mxu1 %vm318_vm7, %v2545_v28 }
 0x319   : > { %1793 = vmatprep.mubr.msk.f32.mxu1 %vm2309_vm6, %v2310_v52 }
 0x31c   : > { %1794 = vmatmul.mubr.msk.f32.gmra.mrb[4].mxu1 %vm318_vm7, %v2547_v29 }
 0x31d   : > { %1800 = vmatprep.mubr.msk.f32.mxu1 %vm2309_vm6, %v2310_v52 }
 0x320   : > { %1801 = vmatmul.mubr.msk.f32.vlgmr.msra.gmra.mrb[0].mxu1 %vm318_vm7, %v492_v55 }
 0x321   : > { %2002 = vmatpush3.bf16.msra.mxu1 %v2001_v44  ;;  %1803 = vmatprep.mubr.msk.f32.mxu1 %vm2309_vm6, %v2310_v52 }
 0x322   : > { %2003 = vmatprep.subr.bf16.mxu1 %v2308_v51 }
 0x324   : > { %1804 = vmatmul.mubr.msk.f32.gmra.mrb[2].mxu1 %vm318_vm7, %v494_v39 }
 0x325   : > { %1806 = vmatprep.mubr.msk.f32.mxu1 %vm2309_vm6, %v2310_v52 }
 0x328   : > { %1807 = vmatmul.mubr.msk.f32.gmra.mrb[4].mxu1 %vm318_vm7, %v496_v50 }
 0x329   : > { %1813 = vmatprep.mubr.msk.f32.mxu1 %vm2309_vm6, %v2310_v52 }
 0x32c   : > { %1814 = vmatmul.mubr.msk.f32.vlgmr.msra.gmra.mrb[0].mxu1 %vm318_vm7, %v593_v53 }
 0x32d   : > { %1816 = vmatprep.mubr.msk.f32.mxu1 %vm2309_vm6, %v2310_v52 }
 0x330   : > { %1817 = vmatmul.mubr.msk.f32.gmra.mrb[2].mxu1 %vm318_vm7, %v595_v54 }
 0x331   : > { %1819 = vmatprep.mubr.msk.f32.mxu1 %vm2309_vm6, %v2310_v52 }
 0x334   : > { %1820 = vmatmul.mubr.msk.f32.gmra.mrb[4].mxu1 %vm318_vm7, %v597_v40  ;;  %v2007_v40 = vpack.c.bf16 %v2562_v32, %v2557_v31 }
 0x335   : > { %1828 = vmatprep.mubr.msk.f32.mxu1 %vm2309_vm6, %v2310_v52 }
 0x336   : > { %2008 = vmatpush3.bf16.msra.mxu0 %v2007_v40 }
 0x337   : > { %2009 = vmatprep.subr.bf16.mxu0 %v2308_v51 }
 0x3ff   : > { %v676_v55 = vpop.f32.mrb[0].mxu1 }
 0x400   : > { %v1815_v56 = vpop.f32.mrb[1].mxu1  ;;  %v693_v58 = vmul.f32 %v676_v55, %v2531_v24  ;;  %v2013_v55 = vpack.c.bf16 %v2582_v36, %v2577_v35 }
 0x401   : > { %v2010_v56 = vpack.c.bf16 %v2572_v34, %v2567_v33 }
 0x403   : > { %v681_v57 = vpop.f32.mrb[2].mxu1  ;;  %2011 = vmatpush3.bf16.msra.mxu0 %v2010_v56  ;;  %v2026_v56 = vpack.c.bf16 %v2913_v5, %v2912_v4 }
 0x404   : > { %v2751_v60 = vmul.f32 %v681_v57, %v2536_v25  ;;  %v1818_v44 = vpop.f32.mrb[3].mxu1  ;;  %v2016_v57 = vpack.c.bf16 %v2592_v38, %v2587_v37 }
 0x406   : > { %v2004_v39 = vpack.c.bf16 %v2751_v60, %v693_v58 }
 0x407   : > { %v686_v50 = vpop.f32.mrb[4].mxu1 }
 0x408   : > { %v1821_v53 = vpop.f32.mrb[5].mxu1  ;;  %2005 = vmatpush3.bf16.msra.mxu1 %v2004_v39  ;;  %v695_v54 = vmul.f32 %v686_v50, %v2541_v26 }
 0x409   : > { %1826 = vmatprep.subr.mxu1 %v2310_v52 }
 0x40c   : > { %1827 = vmatpush3.msk.msra.mxu1 %vm700_vm8, %v695_v54 }
 0x40d   : > { %1829 = vmatmul.mubr.msk.f32.vlgmr.msra.gmra.mrb[6].mxu1 %vm696_vm9, %v2552_v30  ;;  %2012 = vmatprep.subr.bf16.mxu1 %v2308_v51 }
 0x40e   : > { %1850 = vmatprep.mubr.msk.f32.mxu1 %vm2309_vm6, %v2310_v52  ;;  %2014 = vmatpush3.bf16.msra.mxu1 %v2013_v55  ;;  %v2022_v55 = vpack.c.bf16 %v2911_v3, %v2910_v2 }
 0x40f   : > { %2015 = vmatprep.subr.bf16.mxu1 %v2308_v51  ;;  %v2018_v51 = vpack.c.bf16 %v2909_v1, %v2908_v0 }
 0x411   : > { %2019 = vmatprep.subr.bf16.mxu0 %v2018_v51 }
 0x412   : > { %2017 = vmatpush3.bf16.msra.mxu1 %v2016_v57 }
 0x4e0   : > { %v770_v52 = vpop.f32.mrb[6].mxu1 }
 0x4e1   : > { %v775_v44 = vrot.slane %v770_v52, 2  ;;  %v1830_v39 = vpop.f32.mrb[7].mxu1 }
 0x4e3   : > { %776 = vrot.lane.b32.xlu0 %v775_v44, %s2312_s25 }
 0x555   : > { %v777_v50 = vpop.permute.xlu0 %776 }
 0x556   : > { %v779_v53 = vsel %vm318_vm7, %v770_v52, %v777_v50  ;;  %v2030_v52 = vpack.c.bf16 %v2446_v7, %v2441_v6  ;;  %v2316_v7 = vmov (%p216_p2), 0.0|0.0  }
 0x557   : > { %v854_v40 = vrot.slane %v779_v53, 4  ;;  %1840 = vmatmul.mubr.msk.f32.vlgmr.msra.gmra.mrb[2].mxu0 %vm780_vm10, %v779_v53  ;;  %2096 = vmatprep.subr.bf16.mxu1 (%p216_p2), %v2316_v7 }
 0x558   : > { %2021 = vmatpush3.bf16.msra.mxu0 %v2018_v51 }
 0x559   : > { %1851 = vmatmul.mubr.msk.f32.vlgmr.msra.gmra.mrb[8].mxu1 %vm780_vm10, %v854_v40  ;;  %2023 = vmatprep.subr.bf16.mxu0 %v2022_v55  ;;  %v939_v40 = vrot.slane %v2751_v60, 1 }
 0x55a   :  { %1917 = vmatprep.mubr.msk.f32.mxu1 (%p216_p2), %vm2317_vm1, %v2318_v8 }
 0x55c   : > { %2025 = vmatpush3.bf16.msra.mxu0 %v2022_v55 }
 0x55d   : > { %2027 = vmatprep.subr.bf16.mxu0 %v2026_v56 }
 0x560   : > { %2029 = vmatpush3.bf16.msra.mxu0 %v2026_v56 }
 0x561   : > { %2031 = vmatprep.subr.bf16.mxu0 %v2030_v52 }
 0x564   : > { %2033 = vmatpush3.bf16.msra.mxu0 %v2030_v52  ;;  %v963_v52 = vrot.slane %v2751_v60, 3 }
 0x565   :  { %2035 = vmatprep.subr.bf16.mxu0 (%p216_p2), %v2635_v41 }
 0x62a   : > { %v850_v57 = vpop.f32.mrb[2].mxu0 }
 0x62b   : > { %v931_v44 = vsel %vm930_vm11, %v850_v57, %v693_v58  ;;  %v1841_v39 = vpop.f32.mrb[3].mxu0  ;;  %v951_v58 = vrot.slane %v2751_v60, 2 }
 0x62c   : > { %v938_v50 = vrot.slane %v931_v44, 1  ;;  %v923_v53 = vpop.f32.mrb[8].mxu1  ;;  %v950_v0 = vrot.slane %v931_v44, 2  ;;  %v962_v39 = vrot.slane %v931_v44, 3 }
 0x62d   : > { %v928_v51 = vrot.slane %v923_v53, 7  ;;  %v1852_v55 = vpop.f32.mrb[9].mxu1 }
 0x62e   : > { %v940_v1 = vsel %vm937_vm12, %v938_v50, %v939_v40  ;;  %v952_v2 = vsel %vm949_vm14, %v950_v0, %v951_v58  ;;  %v964_v50 = vsel %vm961_vm15, %v962_v39, %v963_v52 }
 0x62f   : > { %v933_v56 = vsel %vm932_vm13, %v695_v54, %v928_v51  ;;  %943 = vrot.lane.b32.xlu1 %v940_v1, %s2312_s25 }
 0x630   : > { %v941_v57 = vrot.slane %v933_v56, 1  ;;  %v953_v4 = vrot.slane %v933_v56, 2  ;;  %v965_v53 = vrot.slane %v933_v56, 3 }
 0x632   : > { %v942_v3 = vsel %vm937_vm12, %v939_v40, %v941_v57  ;;  %v954_v54 = vsel %vm949_vm14, %v951_v58, %v953_v4  ;;  %v966_v1 = vsel %vm961_vm15, %v963_v52, %v965_v53  ;;  %v1062_v52 = vmul.f32 0.49748743, %v2287_v63 }
 0x633   : > { %955 = vrot.lane.b32.xlu1 %v952_v2, %s2313_s26  ;;  %945 = vrot.lane.b32.xlu0 %v942_v3, %s2312_s25 }
 0x637   : > { %967 = vrot.lane.b32.xlu1 %v964_v50, %s2314_s27  ;;  %957 = vrot.lane.b32.xlu0 %v954_v54, %s2313_s26 }
 0x63b   : > { %969 = vrot.lane.b32.xlu0 %v966_v1, %s2314_s27 }
 0x6a1   : > { %v944_v51 = vpop.permute.xlu1 %943 }
 0x6a2   : > { %v973_v40 = vsel %vm318_vm7, %v931_v44, %v944_v51  ;;  %v1061_v44 = vmul.f32 0.49748743, %v2283_v62 }
 0x6a5   : > { %v956_v0 = vpop.permute.xlu1 %955  ;;  %v946_v55 = vpop.permute.xlu0 %945 }
 0x6a6   : > { %v975_v2 = vsel %vm780_vm10, %v973_v40, %v956_v0  ;;  %v974_v4 = vsel %vm318_vm7, %v2751_v60, %v946_v55 }
 0x6a9   : > { %v968_v3 = vpop.permute.xlu1 %967  ;;  %v958_v57 = vpop.permute.xlu0 %957 }
 0x6aa   : > { %v978_v5 = vsel %vm977_vm0, %v975_v2, %v968_v3  ;;  %v976_v56 = vsel %vm780_vm10, %v974_v4, %v958_v57 }
 0x6ab   : > { %1869 = vmatprep.mubr.msk.f32.mxu0 %vm170_vm5, %v978_v5 }
 0x6ad   : > { %v970_v58 = vpop.permute.xlu0 %969 }
 0x6ae   : > { %v979_v39 = vsel %vm977_vm0, %v976_v56, %v970_v58 }
 0x6af   : > { %1870 = vmatmul.mubr.msk.f32.vlgmr.msra.gmra.mrb[4].mxu0 %vm170_vm5, %v979_v39 }
 0x6b0   :  { %2037 = vmatpush3.bf16.msra.mxu0 (%p216_p2), %v2635_v41 }
 0x6b1   :  { %2039 = vmatprep.subr.bf16.mxu0 (%p216_p2), %v2639_v42 }
 0x6b4   :  { %2041 = vmatpush3.bf16.msra.mxu0 (%p216_p2), %v2639_v42 }
 0x6b5   :  { %2043 = vmatprep.subr.bf16.mxu0 (%p216_p2), %v2648_v43 }
 0x6b8   :  { %2045 = vmatpush3.bf16.msra.mxu0 (%p216_p2), %v2648_v43 }
 0x6b9   :  { %2047 = vmatprep.subr.bf16.mxu0 (%p216_p2), %v2657_v45 }
 0x6bc   :  { %2049 = vmatpush3.bf16.msra.mxu0 (%p216_p2), %v2657_v45 }
 0x6bd   :  { %2051 = vmatprep.subr.bf16.mxu0 (%p216_p2), %v2907_v46 }
 0x6c0   :  { %2053 = vmatpush3.bf16.msra.mxu0 (%p216_p2), %v2907_v46 }
 0x6c1   :  { %2055 = vmatprep.subr.bf16.mxu0 (%p216_p2), %v2671_v47 }
 0x6c4   :  { %2057 = vmatpush3.bf16.msra.mxu0 (%p216_p2), %v2671_v47 }
 0x6c5   :  { %2059 = vmatprep.subr.bf16.mxu0 (%p216_p2), %v2677_v48 }
 0x6c8   :  { %2061 = vmatpush3.bf16.msra.mxu0 (%p216_p2), %v2677_v48 }
 0x6c9   :  { %2063 = vmatprep.subr.bf16.mxu0 (%p216_p2), %v2683_v49 }
 0x6cc   :  { %2065 = vmatpush3.bf16.msra.mxu0 (%p216_p2), %v2683_v49 }
 0x6cd   :  { %2066 = vmatprep.subr.bf16.mxu0 (%p216_p2), %v2316_v7 }
 0x782   : > { %v1871_v63 = vpop.f32.mrb[4].mxu0  }
 0x783   : > { %v1064_v50 = vsub.f32 %v1871_v63, %v1062_v52  ;;  %v1052_v62 = vpop.f32.mrb[5].mxu0  }
 0x784   : > { %v1063_v54 = vsub.f32 %v1052_v62, %v1061_v44 }
 0x785   : > { %v1066_v53 = vmul.f32 %v1064_v50, %v1064_v50 }
 0x786   : > { %v1065_v1 = vmul.f32 %v1063_v54, %v1063_v54 }
 0x787   : > { %1071 = vrot.lane.b32.xlu0 %v1066_v53, %s2315_s28 }
 0x788   : > { %1069 = vrot.lane.b32.xlu1 %v1065_v1, %s2315_s28 }
 0x7f9   : > { %v1072_v5 = vpop.permute.xlu0 %1071 }
 0x7fa   : > { %v1076_v60 = vadd.f32 %v1072_v5, %v1066_v53  ;;  %v1070_v51 = vpop.permute.xlu1 %1069 }
 0x7fb   : > { %v1075_v0 = vadd.f32 %v1070_v51, %v1065_v1 }
 0x7fc   : > { %v1078_v55 = vadd.f32 1e-16, %v1076_v60 }
 0x7fd   : > { %v1077_v40 = vadd.f32 1e-16, %v1075_v0 }
 0x7fe   : > { %2194 = vrsqrt.f32 %v1078_v55 }
 0x7ff   : > { %2196 = vrsqrt.f32 %v1077_v40 }
 0x808   : > { %v2195_v2 = vpop.eup %2194 }
 0x809   : > { %v2197_v3 = vpop.eup %2196  ;;  %1087 = vrot.lane.b32.xlu0 %v2195_v2, %s2315_s28  ;;  %v1082_v4 = vmul.f32 %v2195_v2, %v1064_v50 }
 0x80a   : > { %1085 = vrot.lane.b32.xlu1 %v2197_v3, %s2315_s28  ;;  %v1081_v39 = vmul.f32 %v2197_v3, %v1063_v54 }
 0x87a   :  { %218 = sbr.rel (!%p216_p2) target bundleno = 405 (0x195), region = 75 }
 0x87b   : > { %v1088_v57 = vpop.permute.xlu0 %1087 }
 0x87c   : > { %v1092_v56 = vmul.f32 %v1088_v57, %v1064_v50  ;;  %v1086_v58 = vpop.permute.xlu1 %1085 }
 0x87d   : > { %v1091_v52 = vmul.f32 %v1086_v58, %v1063_v54 }
 0x87e   : > { %v1094_v44 = vsel %vm170_vm5, %v1082_v4, %v1092_v56  }
 0x87f   : > { %v1093_v53 = vsel %vm170_vm5, %v1081_v39, %v1091_v52   ;;  %v2914_v40 = vmov %v1094_v44  ;;  %v1096_v6 = vmul.f32 (%p216_p2), %v1094_v44, %v2610_v61 }
 0x880   : > { %v2915_v39 = vmov %v1093_v53  ;;  %v1095_v50 = vmul.f32 (%p216_p2), %v1093_v53, %v2607_v59 }
 0x882   :  { %1904 = vmatprep.mubr.f32.mxu0 %v1095_v50 }
 0x883   :  { %1905 = vmatmul.mubr.f32.vlgmr.msra.gmra.mrb[0].mxu0 %v1096_v6 }
 0x884   :  { %1911 = vmatprep.mubr.msk.f32.mxu0 %vm2317_vm1, %v2318_v8 }
 0x956   :  { %v1906_v9 = vpop.f32.mrb[0].mxu0 }
 0x957   :  { %v1163_v10 = vpop.f32.mrb[1].mxu0 }
 0x958   :  { %v2070_v11 = vpack.c.bf16 %v1906_v9, %v1163_v10  ;;  %v2203_v12 = vpack.i.bf16 %v1906_v9, %v1163_v10 }
 0x95a   :  { %2204 = vrot.lane.b32.xlu1 %v2203_v12, %s2319_s29  ;;  %2199 = vrot.lane.b32.xlu0 %v2203_v12, %s2320_s5 }
 0x95e   :  { %1362 = vrot.lane.b32.xlu1 %v2543_v27, %s2319_s29  ;;  %1179 = vrot.lane.b32.xlu0 %v2547_v29, %s2320_s5 }
 0x962   :  { %2209 = vrot.lane.b32.xlu1 %v2203_v12, %s2321_s30  ;;  %1364 = vrot.lane.b32.xlu0 %v2545_v28, %s2319_s29 }
 0x966   :  { %1366 = vrot.lane.b32.xlu0 %v2547_v29, %s2319_s29  ;;  %1463 = vrot.lane.b32.xlu1 %v2543_v27, %s2321_s30 }
 0x96a   :  { %1175 = vrot.lane.b32.xlu0 %v2543_v27, %s2320_s5  ;;  %1465 = vrot.lane.b32.xlu1 %v2545_v28, %s2321_s30 }
 0x96e   :  { %1177 = vrot.lane.b32.xlu0 %v2545_v28, %s2320_s5  ;;  %1467 = vrot.lane.b32.xlu1 %v2547_v29, %s2321_s30 }
 0x9cc   :  { %v2200_v13 = vpop.permute.xlu0 %2199  ;;  %v2205_v17 = vpop.permute.xlu1 %2204 }
 0x9cd   :  { %v2202_v14 = vunpack.i.h.bf16 %v2200_v13  ;;  %v2201_v15 = vunpack.i.l.bf16 %v2200_v13  ;;  %v2207_v19 = vunpack.i.h.bf16 %v2205_v17  ;;  %v2206_v20 = vunpack.i.l.bf16 %v2205_v17 }
 0x9cf   :  { %v2067_v16 = vpack.c.bf16 %v2202_v14, %v2201_v15  ;;  %v2073_v23 = vpack.c.bf16 %v2207_v19, %v2206_v20 }
 0x9d0   :  { %v1180_v18 = vpop.permute.xlu0 %1179  ;;  %v1363_v22 = vpop.permute.xlu1 %1362 }
 0x9d1   :  { %2068 = vmatpush3.bf16.msra.mxu0 %v2067_v16  ;;  %2097 = vmatpush3.bf16.msra.mxu1 %v2067_v16 }
 0x9d2   :  { %2069 = vmatprep.subr.bf16.mxu1 %v2316_v7 }
 0x9d4   :  { %1918 = vmatmul.mubr.msk.f32.vlgmr.msra.gmra.mrb[0].mxu1 %vm318_vm7, %v1180_v18  ;;  %v1365_v21 = vpop.permute.xlu0 %1364  ;;  %v2210_v31 = vpop.permute.xlu1 %2209 }
 0x9d5   :  { %2071 = vmatpush3.bf16.msra.mxu1 %v2070_v11  ;;  %1924 = vmatprep.mubr.msk.f32.mxu1 %vm2317_vm1, %v2318_v8  ;;  %v2211_v33 = vunpack.i.l.bf16 %v2210_v31 }
 0x9d6   :  { %2072 = vmatprep.subr.bf16.mxu1 %v2316_v7 }
 0x9d8   :  { %1925 = vmatmul.mubr.msk.f32.vlgmr.msra.gmra.mrb[2].mxu1 %vm318_vm7, %v2543_v27  ;;  %v1367_v30 = vpop.permute.xlu0 %1366  ;;  %v2212_v27 = vunpack.i.h.bf16 %v2210_v31  ;;  %v1464_v35 = vpop.permute.xlu1 %1463 }
 0x9d9   :  { %2074 = vmatpush3.bf16.msra.mxu1 %v2073_v23  ;;  %1927 = vmatprep.mubr.msk.f32.mxu1 %vm2317_vm1, %v2318_v8 }
 0x9da   :  { %2075 = vmatprep.subr.bf16.mxu1 %v2316_v7 }
 0x9dc   :  { %1928 = vmatmul.mubr.msk.f32.gmra.mrb[4].mxu1 %vm318_vm7, %v2545_v28  ;;  %v1176_v32 = vpop.permute.xlu0 %1175  ;;  %v2076_v28 = vpack.c.bf16 %v2212_v27, %v2211_v33 }
 0x9dd   :  { %1930 = vmatprep.mubr.msk.f32.mxu1 %vm2317_vm1, %v2318_v8  ;;  %1912 = vmatmul.mubr.msk.f32.vlgmr.msra.gmra.mrb[2].mxu0 %vm318_vm7, %v1176_v32 }
 0x9de   :  { %1914 = vmatprep.mubr.msk.f32.mxu0 %vm2317_vm1, %v2318_v8 }
 0x9e0   :  { %1931 = vmatmul.mubr.msk.f32.gmra.mrb[0].mxu1 %vm318_vm7, %v2547_v29  ;;  %v1178_v34 = vpop.permute.xlu0 %1177  ;;  %v1466_v29 = vpop.permute.xlu1 %1465 }
 0x9e1   :  { %1937 = vmatprep.mubr.msk.f32.mxu1 %vm2317_vm1, %v2318_v8  ;;  %1915 = vmatmul.mubr.msk.f32.gmra.mrb[4].mxu0 %vm318_vm7, %v1178_v34 }
 0x9e4   :  { %1938 = vmatmul.mubr.msk.f32.vlgmr.msra.gmra.mrb[2].mxu1 %vm318_vm7, %v1363_v22  ;;  %v1468_v36 = vpop.permute.xlu1 %1467 }
 0x9e5   :  { %2077 = vmatpush3.bf16.msra.mxu1 %v2076_v28  ;;  %1940 = vmatprep.mubr.msk.f32.mxu1 %vm2317_vm1, %v2318_v8 }
 0x9e8   :  { %1941 = vmatmul.mubr.msk.f32.gmra.mrb[4].mxu1 %vm318_vm7, %v1365_v21 }
 0x9e9   :  { %1943 = vmatprep.mubr.msk.f32.mxu1 %vm2317_vm1, %v2318_v8 }
 0x9ec   :  { %1944 = vmatmul.mubr.msk.f32.gmra.mrb[0].mxu1 %vm318_vm7, %v1367_v30 }
 0x9ed   :  { %1950 = vmatprep.mubr.msk.f32.mxu1 %vm2317_vm1, %v2318_v8 }
 0x9f0   :  { %1951 = vmatmul.mubr.msk.f32.vlgmr.msra.gmra.mrb[2].mxu1 %vm318_vm7, %v1464_v35 }
 0x9f1   :  { %1953 = vmatprep.mubr.msk.f32.mxu1 %vm2317_vm1, %v2318_v8 }
 0x9f4   :  { %1954 = vmatmul.mubr.msk.f32.gmra.mrb[4].mxu1 %vm318_vm7, %v1466_v29 }
 0x9f5   :  { %1956 = vmatprep.mubr.msk.f32.mxu1 %vm2317_vm1, %v2318_v8 }
 0x9f8   :  { %1957 = vmatmul.mubr.msk.f32.gmra.mrb[0].mxu1 %vm318_vm7, %v1468_v36 }
 0xab0   :  { %v1262_v37 = vpop.f32.mrb[2].mxu0 }
 0xab1   :  { %v1913_v38 = vpop.f32.mrb[3].mxu0 }
 0xab4   :  { %v1267_v59 = vpop.f32.mrb[4].mxu0 }
 0xab5   :  { %v1916_v61 = vpop.f32.mrb[5].mxu0 }
 0xac3   :  { %v1547_v62 = vpop.f32.mrb[2].mxu1 }
 0xac4   :  { %v2098_v63 = vadd.f32 %v1547_v62, %v1262_v37  ;;  %v1952_v41 = vpop.f32.mrb[3].mxu1 }
 0xac6   :  { %v1564_v42 = vmul.f32 %v2098_v63, %v2531_v24 }
 0xac7   :  { %v1552_v43 = vpop.f32.mrb[4].mxu1 }
 0xac8   :  { %1568 = vst.msk [vmem:[%s2900_s10 - $0x2] sm:$0xfc] %vm1567_vm2, %v1564_v42  ;;  %v2099_v45 = vadd.f32 %v1552_v43, %v1267_v59  ;;  %v1955_v46 = vpop.f32.mrb[5].mxu1 }
 0xaca   :  { %v1565_v47 = vmul.f32 %v2099_v45, %v2536_v25 }
 0xacb   :  { %v1557_v48 = vpop.f32.mrb[0].mxu1 }
 0xacc   :  { %1569 = vst.msk [vmem:[%s2900_s10 + $0x6] sm:$0xff] %vm318_vm7, %v1565_v47  ;;  %v1566_v49 = vmul.f32 %v1557_v48, %v2541_v26  ;;  %v1958_v54 = vpop.f32.mrb[1].mxu1 }
 0xace   :  { %1571 = vst.msk [vmem:[%s2900_s10 + $0xe] sm:$0x1] %vm1570_vm3, %v1566_v49 }
 0xacf   :  { %1576 = vsyncpa [#allocation3], 1 }
 0xad0   :  { %1577 = vsyncpa [#allocation5], 1 }

</bundles_post_ra>
